<compile_context>
chip_gen: v7x
topology: tpu7x:2x2x1
jax: 0.10.0
libtpu: 0.0.40
codegen_flags: <defaults>
</compile_context>

<pallas_src>
import jax
import jax.numpy as jnp
from jax.experimental import pallas as pl
from jax.experimental.pallas import tpu as pltpu

_SUBLANES = 8
_SMALL_BYTES = 1 << 20          # <= 1 MiB: single-block path (launch-overhead bound)
_TARGET_TILE_BYTES = 1 << 20    # ~1 MiB per input buffer in the tiled path
_MAX_ROWS_TILE = 1024           # safe on v5e/v6e/v7x scoped-VMEM defaults


def _diversity_loss_small_kernel(p_ref, scale_ref, o_ref):
    # p_ref: full (G, V) perplexity in VMEM (native dtype).
    # scale_ref: (1,) f32 in SMEM holding alpha / (G*V).
    # o_ref: (1,) f32 in SMEM.
    p = p_ref[...].astype(jnp.float32)                      # in-kernel upcast
    safe = jnp.maximum(p, jnp.finfo(jnp.float32).tiny)      # xlogy guard, 1 VPU op
    ent = jnp.sum(p * jnp.log(safe))                        # sum_g sum_v p*log(p)
    o_ref[0] = ent * scale_ref[0]


def _diversity_loss_tiled_kernel(p_ref, scale_ref, o_ref, acc_ref):
    # p_ref: (rows_tile, V) tile in VMEM; scale_ref/o_ref: (1,) f32 SMEM;
    # acc_ref: (1,) f32 SMEM accumulator (persists across the grid).
    i = pl.program_id(0)

    @pl.when(i == 0)
    def _():
        acc_ref[0] = jnp.float32(0.0)

    p = p_ref[...].astype(jnp.float32)
    safe = jnp.maximum(p, jnp.finfo(jnp.float32).tiny)      # zero-padded rows add 0
    acc_ref[0] += jnp.sum(p * jnp.log(safe))

    @pl.when(i == pl.num_programs(0) - 1)
    def _():
        o_ref[0] = acc_ref[0] * scale_ref[0]


def diversity_loss(perplexity, *, alpha):
    """JAX/Pallas equivalent of DiversityLoss.forward.

    Args:
      perplexity: float array of shape (G, V), any float dtype (f32/bf16).
      alpha: loss_alpha scale (Python float or traced scalar).

    Returns:
      float32 array of shape (1,): alpha * sum(p * log p) / (G * V).
    """
    G, V = perplexity.shape
    n = G * V
    itemsize = jnp.dtype(perplexity.dtype).itemsize
    nbytes = n * itemsize

    # Works for both static and traced alpha (no float() at trace time).
    scale = (jnp.asarray(alpha, jnp.float32) / jnp.float32(n)).reshape(1)

    if nbytes <= _SMALL_BYTES:
        # Single-block path: no grid, no padding, no reshape. Full array is the
        # block, so the (8,128) tile-divisibility rule does not apply.
        return pl.pallas_call(
            _diversity_loss_small_kernel,
            out_shape=jax.ShapeDtypeStruct((1,), jnp.float32),
            in_specs=[
                pl.BlockSpec(memory_space=pltpu.MemorySpace.VMEM),
                pl.BlockSpec(memory_space=pltpu.MemorySpace.SMEM),
            ],
            out_specs=pl.BlockSpec(memory_space=pltpu.MemorySpace.SMEM),
            compiler_params=pltpu.CompilerParams(
                # Let XLA fuse the perplexity producer (e.g. softmax) into the
                # kernel input instead of materializing it in HBM.
                allow_input_fusion=[True, False],
            ),
            cost_estimate=pl.CostEstimate(
                flops=2 * n, transcendentals=n, bytes_accessed=nbytes + 8),
        )(perplexity, scale)

    # ---- Tiled path for large inputs: 1-D grid over rows, block (rows_tile, V).
    # rows_tile: multiple of 8, ~1 MiB per buffer, capped so double-buffering
    # fits the scoped-VMEM defaults on v5e/v6e/v7x.
    rows_per_target = (_TARGET_TILE_BYTES // max(1, V * itemsize)) // _SUBLANES * _SUBLANES
    rows_tile = int(max(_SUBLANES, min(_MAX_ROWS_TILE, rows_per_target)))
    num_tiles = pl.cdiv(G, rows_tile)
    padded_rows = num_tiles * rows_tile
    if padded_rows != G:
        # Zero rows contribute exactly 0 thanks to the in-kernel guard.
        perplexity = jnp.pad(perplexity, ((0, padded_rows - G), (0, 0)))

    padded_n = padded_rows * V
    return pl.pallas_call(
        _diversity_loss_tiled_kernel,
        out_shape=jax.ShapeDtypeStruct((1,), jnp.float32),
        grid=(num_tiles,),
        in_specs=[
            pl.BlockSpec((rows_tile, V), lambda i: (i, 0)),
            pl.BlockSpec(memory_space=pltpu.MemorySpace.SMEM),
        ],
        out_specs=pl.BlockSpec(memory_space=pltpu.MemorySpace.SMEM),
        scratch_shapes=[pltpu.SMEM((1,), jnp.float32)],
        compiler_params=pltpu.CompilerParams(
            dimension_semantics=("arbitrary",),
        ),
        cost_estimate=pl.CostEstimate(
            flops=2 * padded_n,
            transcendentals=padded_n,
            bytes_accessed=padded_n * itemsize + 8),
    )(perplexity, scale)


if __name__ == "__main__":
    # wav2vec2-style quantizer sizes: num_code_vector_groups G = 4,
    # num_code_vectors_per_group V = 128, loss_alpha = 0.1.
    G, V = 4, 128
    alpha = 0.1

    key = jax.random.PRNGKey(0)
    logits = jax.random.normal(key, (G, V), dtype=jnp.float32)
    perplexity = jax.nn.softmax(logits, axis=-1)   # positive, so log() is well defined

    # --- small (single-block) path, f32 ---
    out = jax.block_until_ready(diversity_loss(perplexity, alpha=alpha))
    ref = alpha * jnp.sum(perplexity * jnp.log(perplexity)) / (G * V)
    assert jnp.allclose(out[0], ref, rtol=1e-5, atol=1e-6), (out, ref)

    # --- small path, native bf16 input (f32 math inside the kernel) ---
    p_bf16 = perplexity.astype(jnp.bfloat16)
    out_bf16 = jax.block_until_ready(diversity_loss(p_bf16, alpha=alpha))
    p32 = p_bf16.astype(jnp.float32)
    ref_bf16 = alpha * jnp.sum(p32 * jnp.log(p32)) / (G * V)
    assert jnp.allclose(out_bf16[0], ref_bf16, rtol=1e-3, atol=1e-4), (out_bf16, ref_bf16)

    # --- tiled path (large synthetic input, rows not a multiple of the tile) ---
    G2, V2 = 2000, 256
    logits2 = jax.random.normal(jax.random.PRNGKey(0), (G2, V2), dtype=jnp.float32)
    p2 = jax.nn.softmax(logits2, axis=-1)
    out2 = jax.block_until_ready(diversity_loss(p2, alpha=alpha))
    ref2 = alpha * jnp.sum(p2 * jnp.log(p2)) / (G2 * V2)
    assert jnp.allclose(out2[0], ref2, rtol=1e-4, atol=1e-6), (out2, ref2)

    print("KERNEL_OK")
</pallas_src>

<mosaic_0001>
module attributes {stable_mosaic.version = 11 : i64} {
  func.func @_diversity_loss_small_kernel(%arg0: memref<4x128xf32, #tpu.memory_space<vmem>>, %arg1: memref<1xf32, #tpu.memory_space<smem>>, %arg2: memref<1xf32, #tpu.memory_space<smem>>) attributes {dimension_semantics = [], scalar_prefetch = 0 : i64, scratch_operands = 0 : i64, tpu.core_type = #tpu.core_type<tc>} {
    %c0 = arith.constant 0 : index
    %c0_0 = arith.constant 0 : index
    %0 = vector.load %arg0[%c0, %c0_0] : memref<4x128xf32, #tpu.memory_space<vmem>>, vector<4x128xf32>
    %cst = arith.constant 1.17549435E-38 : f32
    %1 = vector.broadcast %cst : f32 to vector<4x128xf32>
    %2 = arith.maximumf %0, %1 : vector<4x128xf32>
    %3 = math.log %2 : vector<4x128xf32>
    %4 = arith.mulf %0, %3 : vector<4x128xf32>
    %5 = vector.shape_cast %4 : vector<4x128xf32> to vector<1x4x128xf32>
    %cst_1 = arith.constant dense<0.000000e+00> : vector<1xf32>
    %6 = vector.multi_reduction <add>, %5, %cst_1 [1, 2] : vector<1x4x128xf32> to vector<1xf32>
    %7 = vector.shape_cast %6 : vector<1xf32> to vector<1x1x1xf32>
    %8 = vector.extract %7[0, 0, 0] : f32 from vector<1x1x1xf32>
    %c0_2 = arith.constant 0 : index
    %9 = memref.load %arg1[%c0_2] : memref<1xf32, #tpu.memory_space<smem>>
    %10 = arith.mulf %8, %9 : f32
    %c0_3 = arith.constant 0 : index
    %11 = memref.load %arg2[%c0_3] : memref<1xf32, #tpu.memory_space<smem>>
    memref.store %10, %arg2[%c0_3] : memref<1xf32, #tpu.memory_space<smem>>
    return
  }
}

</mosaic_0001>

<bundles_post_ra>
// kernel: tpu_custom_call.1
= control target key start
LH: loop header
LB: loop body
LE: loop exit
PB: predicated region body
PF: predicated region fallthrough
CT: control target
= control target key end

     0   :  { %8 = vsyncpa [#allocation4], 0  ;;  %s145_s0 = inlined_call_operand.hbm [shape: f32[4,128], index: 0, kind: input, shape index: {}]   ;;  %s146_s1 = inlined_call_operand.<no memory space> [shape: f32[1], index: 1, kind: input, shape index: {}]   ;;  %s147_s2 = inlined_call_operand.hbm [shape: f32[1], index: 2, kind: output, shape index: {}]  }
   0x1   :  { %9 = vsyncpa [#allocation5], 0  ;;  %s101_s9 = smov [#allocation3]   ;;  %s65_s13 = scalar_lea.hbm %s145_s0, 64 }
   0x2   :  { %s16_s10 = sshll.u32 %s101_s9, 4  ;;  %p66_p0 = scmp.ne.s32.totalorder %s145_s0, %s65_s13  ;;  %s17_s10 = int_to_ptr.vmem [resolvable:$true] %s16_s10 }
   0x3   :  { %p69_p1 = scmp.lt.u32.totalorder %s65_s13, %s145_s0 }
   0x5   :  { %p71_p2 = pnand %p69_p1, %p66_p0 }
   0x7   :  { %74 = shalt.err (!%p71_p2)
}
   0x8   :  { %s75_s18 = scalar_lea.vmem %s17_s10, 64  ;;  %p80_p4 = scmp.lt.s32.totalorder %s17_s10, %s17_s10 }
   0x9   :  { %p76_p3 = scmp.ne.s32.totalorder %s17_s10, %s75_s18  ;;  %p81_p5 = scmp.lt.s32.totalorder %s75_s18, %s75_s18 }
   0xb   :  { %p82_p6 = por %p81_p5, %p80_p4 }
   0xd   :  { %p83_p7 = pnand %p82_p6, %p76_p3 }
   0xf   :  { %86 = shalt.err (!%p83_p7)
}
  0x10   :  { %19 = dma.hbm_to_vmem [thread:$0]  %s145_s0, 64, %s17_s10, [#allocation4]  }
  0x11   :  { %97 = dma.done.wait [#allocation4], 64  }
  0x12   :  { %98 = vsyncadd [#allocation4], 4294967232  ;;  %v25_v0 = vld [vmem:[#allocation3] sm:$0xf]  ;;  %vm30_vm0 = vcmask 1043456   ;;  %s87_s26 = scalar_lea.hbm %s147_s2, 16 }
  0x13   :  { %v26_v1 = vmax.f32 %v25_v0, 1.1754944e-38  ;;  %p88_p8 = scmp.ne.s32.totalorder %s147_s2, %s87_s26  ;;  %p91_p9 = scmp.lt.u32.totalorder %s87_s26, %s147_s2 }
  0x15   :  { %63 = vlog2.f32 %v26_v1  ;;  %p93_p10 = pnand %p91_p9, %p88_p8 }
  0x1f   :  { %v64_v2 = vpop.eup %63 }
  0x20   :  { %v28_v3 = vmul.f32 0.6931472, %v64_v2 }
  0x22   :  { %v29_v4 = vmul.f32 %v28_v3, %v25_v0 }
  0x24   :  { %v31_v5 = vsel %vm30_vm0, %v29_v4, 0.0 }
  0x25   :  { %32 = vadd.xlane.f32.xlu0 %v31_v5 }
  0xb2   :  { %v33_v6 = vpop.xlane.xlu0 %32 }
  0xb3   :  { %v34_v7 = vrot.slane %v33_v6, 4 }
  0xb5   :  { %v35_v8 = vadd.f32 %v34_v7, %v33_v6 }
  0xb7   :  { %v36_v9 = vrot.slane %v35_v8, 2 }
  0xb9   :  { %v37_v10 = vadd.f32 %v36_v9, %v35_v8 }
  0xbb   :  { %v38_v11 = vrot.slane %v37_v10, 1 }
  0xbd   :  { %v39_v12 = vadd.f32 %v38_v11, %v37_v10 }
  0xbf   :  { %59 = vpush %v39_v12 }
  0xf0   :  { %s60_s0 = spop %59 }
  0xf1   :  { %s42_s23 = smul.f32 %s60_s0, %s146_s1 }
  0xf3   :  { %44 = sst [smem:[#allocation6]] %s42_s23 }
  0xf4   :  { %96 = shalt.err (!%p93_p10)
}
  0xf5   :  { %s102_s3 = smov [#allocation6]  }
  0xf6   :  { %52 = dma.smem_to_hbm %s102_s3, 16, %s147_s2, [#allocation5]  }
  0xf7   :  { %99 = dma.done.wait [#allocation5], 16  }
  0xf8   :  { %100 = vsyncadd [#allocation5], 4294967280 }
  0xf9   :  { %56 = sfence }
  0xfa   :  { %57 = vsyncpa [#allocation4], 1 }
  0xfb   :  { %58 = vsyncpa [#allocation5], 1 }

</bundles_post_ra>
